<compile_context>
chip_gen: v6e
topology: v6e:2x2x1
jax: 0.10.0
libtpu: 0.0.40
codegen_flags: <defaults>
</compile_context>

<pallas_src>
import functools

import jax
import jax.numpy as jnp
from jax.experimental import pallas as pl
from jax.experimental.pallas import tpu as pltpu

C_OUT = 256
KSIZE = 20


def _round_up(x, m):
    return ((x + m - 1) // m) * m


def conv1d_relu_kernel(x_ref, wt_ref, o_ref, s_ref, *, k_taps, k_pad, l_tile):
    """x_ref : (1, L_in_pad)   f32 — this batch's input row, zero-padded tail.
       wt_ref: (C, K_pad)      f32 — cols 0..K-1 = conv taps, col K = bias, rest 0.
       o_ref : (C, L_tile)     f32 — this batch's (C, L) output slab (lane-dense).
       s_ref : (K_pad, L_tile) f32 — im2col scratch, rebuilt each grid step."""
    x = x_ref[...]                                            # (1, L_in_pad)

    # Tap-major shifted rows: S[k, :] = x[k : k + L_tile].  Static lane windows
    # of an aligned row, stored straight into the VMEM scratch.
    for kk in range(k_taps):
        s_ref[kk:kk + 1, :] = x[:, kk:kk + l_tile]

    # Rows K..K_pad-1 are all-ones: row K pairs with the bias column of wt,
    # rows K+1.. pair with zero weight columns (contribute exactly 0).
    # Rewritten every step so the "parallel" grid (per-core scratch on v7x)
    # stays correct.
    s_ref[k_taps:, :] = jnp.ones((k_pad - k_taps, l_tile), jnp.float32)

    # Hot path: one MXU matmul (bias folded in) + ReLU, unmasked lane-dense store.
    y = jnp.dot(wt_ref[...], s_ref[...], preferred_element_type=jnp.float32)
    o_ref[...] = jnp.maximum(y, 0.0)


def conv1d_relu(x_ncl, weight, bias):
    """x_ncl: (N, 1, L) f32, weight: (C_out, 1, K) f32, bias: (C_out,) f32.
    Returns (N, C_out, L_out) matching PyTorch nn.Conv1d(1, C_out, K) + F.relu."""
    n, c_in, l = x_ncl.shape
    assert c_in == 1
    c_out, _, k = weight.shape
    assert l >= k
    l_out = l - k + 1

    k_pad = _round_up(k + 1, 8)                 # taps + bias row -> full sublane tiles
    l_tile = _round_up(l_out, 128)              # lane-dense output tile
    l_in_pad = _round_up(l_tile + k - 1, 128)   # padded input row length

    # Wrapper-side glue (tiny, constant-ish): pad input rows; build weight with
    # the bias folded into column K.
    x_rows = jnp.pad(x_ncl.astype(jnp.float32), ((0, 0), (0, 0), (0, l_in_pad - l)))
    wt = jnp.concatenate(
        [weight.astype(jnp.float32).reshape(c_out, k),
         bias.astype(jnp.float32).reshape(c_out, 1),
         jnp.zeros((c_out, k_pad - k - 1), jnp.float32)],
        axis=1)                                                        # (C, K_pad)

    kernel = functools.partial(conv1d_relu_kernel,
                               k_taps=k, k_pad=k_pad, l_tile=l_tile)

    out = pl.pallas_call(
        kernel,
        out_shape=jax.ShapeDtypeStruct((n, c_out, l_out), jnp.float32),
        grid=(n,),
        in_specs=[
            pl.BlockSpec((None, 1, l_in_pad), lambda i: (i, 0, 0)),    # per-batch row
            pl.BlockSpec((c_out, k_pad), lambda i: (0, 0)),            # weights (const)
        ],
        # Output block is (C, L_tile) lane-dense in VMEM; Pallas masks the
        # writeback to the valid L_out columns of the (N, C, L_out) array.
        out_specs=pl.BlockSpec((None, c_out, l_tile), lambda i: (i, 0, 0)),
        scratch_shapes=[pltpu.VMEM((k_pad, l_tile), jnp.float32)],
        compiler_params=pltpu.CompilerParams(dimension_semantics=("parallel",)),
        cost_estimate=pl.CostEstimate(
            flops=2 * n * c_out * k_pad * l_tile,
            transcendentals=0,
            bytes_accessed=4 * (n * l_in_pad + c_out * k_pad + n * c_out * l_out),
        ),
    )(x_rows, wt)
    return out


def reference(x_ncl, weight, bias):
    """Pure-JAX reference (lax conv) for correctness check."""
    y = jax.lax.conv_general_dilated(
        x_ncl, weight, window_strides=(1,), padding="VALID",
        dimension_numbers=("NCH", "OIH", "NCH"))
    y = y + bias.reshape(1, -1, 1)
    return jnp.maximum(y, 0.0)


if __name__ == "__main__":
    key = jax.random.PRNGKey(0)
    k_x, k_w, k_b = jax.random.split(key, 3)

    # Small, deterministic shapes consistent with the module: (N=2, C_in=1, L=64)
    N, L = 2, 64
    x = jax.random.normal(k_x, (N, 1, L), dtype=jnp.float32)

    # Deterministic param init (Conv1d default: U(-1/sqrt(fan_in), 1/sqrt(fan_in)))
    fan_in = 1 * KSIZE
    bound = 1.0 / (fan_in ** 0.5)
    weight = jax.random.uniform(k_w, (C_OUT, 1, KSIZE), jnp.float32, -bound, bound)
    bias = jax.random.uniform(k_b, (C_OUT,), jnp.float32, -bound, bound)

    out = jax.block_until_ready(conv1d_relu(x, weight, bias))
    ref = jax.block_until_ready(reference(x, weight, bias))

    assert out.shape == (N, C_OUT, L - KSIZE + 1), out.shape
    assert jnp.allclose(out, ref, atol=1e-4, rtol=1e-4), \
        float(jnp.max(jnp.abs(out - ref)))

    print("KERNEL_OK")
</pallas_src>

<mosaic_0001>
module attributes {stable_mosaic.version = 11 : i64} {
  func.func @conv1d_relu_kernel(%arg0: i32, %arg1: memref<1x1x256xf32, #tpu.memory_space<vmem>>, %arg2: memref<256x24xf32, #tpu.memory_space<vmem>>, %arg3: memref<1x256x128xf32, #tpu.memory_space<vmem>>, %arg4: memref<24x128xf32, #tpu.memory_space<vmem>>) attributes {dimension_semantics = [#tpu.dimension_semantics<parallel>], iteration_bounds = array<i64: 2>, scalar_prefetch = 0 : i64, scratch_operands = 1 : i64, tpu.core_type = #tpu.core_type<tc>, window_params = [{transform_indices = @transform_0, window_bounds = array<i64: 1, 1, 256>}, {pipeline_mode = #tpu.pipeline_mode<synchronous>, transform_indices = @transform_1, window_bounds = array<i64: 256, 24>}, {transform_indices = @transform_2, window_bounds = array<i64: 1, 256, 128>}]} {
    %c0 = arith.constant 0 : index
    %c0_0 = arith.constant 0 : index
    %c0_1 = arith.constant 0 : index
    %0 = vector.load %arg1[%c0, %c0_0, %c0_1] : memref<1x1x256xf32, #tpu.memory_space<vmem>>, vector<1x1x256xf32>
    %1 = vector.shape_cast %0 : vector<1x1x256xf32> to vector<1x256xf32>
    %2 = vector.extract_strided_slice %1 {offsets = [0, 0], sizes = [1, 128], strides = [1, 1]} : vector<1x256xf32> to vector<1x128xf32>
    %c0_2 = arith.constant 0 : index
    %c0_3 = arith.constant 0 : index
    %3 = vector.load %arg4[%c0_2, %c0_3] : memref<24x128xf32, #tpu.memory_space<vmem>>, vector<1x128xf32>
    tpu.vector_store %arg4[%c0_2, %c0_3], %2 {strides = array<i32>} : memref<24x128xf32, #tpu.memory_space<vmem>>, vector<1x128xf32>,
    %4 = vector.extract_strided_slice %1 {offsets = [0, 1], sizes = [1, 128], strides = [1, 1]} : vector<1x256xf32> to vector<1x128xf32>
    %c1 = arith.constant 1 : index
    %c0_4 = arith.constant 0 : index
    %5 = vector.load %arg4[%c1, %c0_4] : memref<24x128xf32, #tpu.memory_space<vmem>>, vector<1x128xf32>
    tpu.vector_store %arg4[%c1, %c0_4], %4 {strides = array<i32>} : memref<24x128xf32, #tpu.memory_space<vmem>>, vector<1x128xf32>,
    %6 = vector.extract_strided_slice %1 {offsets = [0, 2], sizes = [1, 128], strides = [1, 1]} : vector<1x256xf32> to vector<1x128xf32>
    %c2 = arith.constant 2 : index
    %c0_5 = arith.constant 0 : index
    %7 = vector.load %arg4[%c2, %c0_5] : memref<24x128xf32, #tpu.memory_space<vmem>>, vector<1x128xf32>
    tpu.vector_store %arg4[%c2, %c0_5], %6 {strides = array<i32>} : memref<24x128xf32, #tpu.memory_space<vmem>>, vector<1x128xf32>,
    %8 = vector.extract_strided_slice %1 {offsets = [0, 3], sizes = [1, 128], strides = [1, 1]} : vector<1x256xf32> to vector<1x128xf32>
    %c3 = arith.constant 3 : index
    %c0_6 = arith.constant 0 : index
    %9 = vector.load %arg4[%c3, %c0_6] : memref<24x128xf32, #tpu.memory_space<vmem>>, vector<1x128xf32>
    tpu.vector_store %arg4[%c3, %c0_6], %8 {strides = array<i32>} : memref<24x128xf32, #tpu.memory_space<vmem>>, vector<1x128xf32>,
    %10 = vector.extract_strided_slice %1 {offsets = [0, 4], sizes = [1, 128], strides = [1, 1]} : vector<1x256xf32> to vector<1x128xf32>
    %c4 = arith.constant 4 : index
    %c0_7 = arith.constant 0 : index
    %11 = vector.load %arg4[%c4, %c0_7] : memref<24x128xf32, #tpu.memory_space<vmem>>, vector<1x128xf32>
    tpu.vector_store %arg4[%c4, %c0_7], %10 {strides = array<i32>} : memref<24x128xf32, #tpu.memory_space<vmem>>, vector<1x128xf32>,
    %12 = vector.extract_strided_slice %1 {offsets = [0, 5], sizes = [1, 128], strides = [1, 1]} : vector<1x256xf32> to vector<1x128xf32>
    %c5 = arith.constant 5 : index
    %c0_8 = arith.constant 0 : index
    %13 = vector.load %arg4[%c5, %c0_8] : memref<24x128xf32, #tpu.memory_space<vmem>>, vector<1x128xf32>
    tpu.vector_store %arg4[%c5, %c0_8], %12 {strides = array<i32>} : memref<24x128xf32, #tpu.memory_space<vmem>>, vector<1x128xf32>,
    %14 = vector.extract_strided_slice %1 {offsets = [0, 6], sizes = [1, 128], strides = [1, 1]} : vector<1x256xf32> to vector<1x128xf32>
    %c6 = arith.constant 6 : index
    %c0_9 = arith.constant 0 : index
    %15 = vector.load %arg4[%c6, %c0_9] : memref<24x128xf32, #tpu.memory_space<vmem>>, vector<1x128xf32>
    tpu.vector_store %arg4[%c6, %c0_9], %14 {strides = array<i32>} : memref<24x128xf32, #tpu.memory_space<vmem>>, vector<1x128xf32>,
    %16 = vector.extract_strided_slice %1 {offsets = [0, 7], sizes = [1, 128], strides = [1, 1]} : vector<1x256xf32> to vector<1x128xf32>
    %c7 = arith.constant 7 : index
    %c0_10 = arith.constant 0 : index
    %17 = vector.load %arg4[%c7, %c0_10] : memref<24x128xf32, #tpu.memory_space<vmem>>, vector<1x128xf32>
    tpu.vector_store %arg4[%c7, %c0_10], %16 {strides = array<i32>} : memref<24x128xf32, #tpu.memory_space<vmem>>, vector<1x128xf32>,
    %18 = vector.extract_strided_slice %1 {offsets = [0, 8], sizes = [1, 128], strides = [1, 1]} : vector<1x256xf32> to vector<1x128xf32>
    %c8 = arith.constant 8 : index
    %c0_11 = arith.constant 0 : index
    %19 = vector.load %arg4[%c8, %c0_11] : memref<24x128xf32, #tpu.memory_space<vmem>>, vector<1x128xf32>
    tpu.vector_store %arg4[%c8, %c0_11], %18 {strides = array<i32>} : memref<24x128xf32, #tpu.memory_space<vmem>>, vector<1x128xf32>,
    %20 = vector.extract_strided_slice %1 {offsets = [0, 9], sizes = [1, 128], strides = [1, 1]} : vector<1x256xf32> to vector<1x128xf32>
    %c9 = arith.constant 9 : index
    %c0_12 = arith.constant 0 : index
    %21 = vector.load %arg4[%c9, %c0_12] : memref<24x128xf32, #tpu.memory_space<vmem>>, vector<1x128xf32>
    tpu.vector_store %arg4[%c9, %c0_12], %20 {strides = array<i32>} : memref<24x128xf32, #tpu.memory_space<vmem>>, vector<1x128xf32>,
    %22 = vector.extract_strided_slice %1 {offsets = [0, 10], sizes = [1, 128], strides = [1, 1]} : vector<1x256xf32> to vector<1x128xf32>
    %c10 = arith.constant 10 : index
    %c0_13 = arith.constant 0 : index
    %23 = vector.load %arg4[%c10, %c0_13] : memref<24x128xf32, #tpu.memory_space<vmem>>, vector<1x128xf32>
    tpu.vector_store %arg4[%c10, %c0_13], %22 {strides = array<i32>} : memref<24x128xf32, #tpu.memory_space<vmem>>, vector<1x128xf32>,
    %24 = vector.extract_strided_slice %1 {offsets = [0, 11], sizes = [1, 128], strides = [1, 1]} : vector<1x256xf32> to vector<1x128xf32>
    %c11 = arith.constant 11 : index
    %c0_14 = arith.constant 0 : index
    %25 = vector.load %arg4[%c11, %c0_14] : memref<24x128xf32, #tpu.memory_space<vmem>>, vector<1x128xf32>
    tpu.vector_store %arg4[%c11, %c0_14], %24 {strides = array<i32>} : memref<24x128xf32, #tpu.memory_space<vmem>>, vector<1x128xf32>,
    %26 = vector.extract_strided_slice %1 {offsets = [0, 12], sizes = [1, 128], strides = [1, 1]} : vector<1x256xf32> to vector<1x128xf32>
    %c12 = arith.constant 12 : index
    %c0_15 = arith.constant 0 : index
    %27 = vector.load %arg4[%c12, %c0_15] : memref<24x128xf32, #tpu.memory_space<vmem>>, vector<1x128xf32>
    tpu.vector_store %arg4[%c12, %c0_15], %26 {strides = array<i32>} : memref<24x128xf32, #tpu.memory_space<vmem>>, vector<1x128xf32>,
    %28 = vector.extract_strided_slice %1 {offsets = [0, 13], sizes = [1, 128], strides = [1, 1]} : vector<1x256xf32> to vector<1x128xf32>
    %c13 = arith.constant 13 : index
    %c0_16 = arith.constant 0 : index
    %29 = vector.load %arg4[%c13, %c0_16] : memref<24x128xf32, #tpu.memory_space<vmem>>, vector<1x128xf32>
    tpu.vector_store %arg4[%c13, %c0_16], %28 {strides = array<i32>} : memref<24x128xf32, #tpu.memory_space<vmem>>, vector<1x128xf32>,
    %30 = vector.extract_strided_slice %1 {offsets = [0, 14], sizes = [1, 128], strides = [1, 1]} : vector<1x256xf32> to vector<1x128xf32>
    %c14 = arith.constant 14 : index
    %c0_17 = arith.constant 0 : index
    %31 = vector.load %arg4[%c14, %c0_17] : memref<24x128xf32, #tpu.memory_space<vmem>>, vector<1x128xf32>
    tpu.vector_store %arg4[%c14, %c0_17], %30 {strides = array<i32>} : memref<24x128xf32, #tpu.memory_space<vmem>>, vector<1x128xf32>,
    %32 = vector.extract_strided_slice %1 {offsets = [0, 15], sizes = [1, 128], strides = [1, 1]} : vector<1x256xf32> to vector<1x128xf32>
    %c15 = arith.constant 15 : index
    %c0_18 = arith.constant 0 : index
    %33 = vector.load %arg4[%c15, %c0_18] : memref<24x128xf32, #tpu.memory_space<vmem>>, vector<1x128xf32>
    tpu.vector_store %arg4[%c15, %c0_18], %32 {strides = array<i32>} : memref<24x128xf32, #tpu.memory_space<vmem>>, vector<1x128xf32>,
    %34 = vector.extract_strided_slice %1 {offsets = [0, 16], sizes = [1, 128], strides = [1, 1]} : vector<1x256xf32> to vector<1x128xf32>
    %c16 = arith.constant 16 : index
    %c0_19 = arith.constant 0 : index
    %35 = vector.load %arg4[%c16, %c0_19] : memref<24x128xf32, #tpu.memory_space<vmem>>, vector<1x128xf32>
    tpu.vector_store %arg4[%c16, %c0_19], %34 {strides = array<i32>} : memref<24x128xf32, #tpu.memory_space<vmem>>, vector<1x128xf32>,
    %36 = vector.extract_strided_slice %1 {offsets = [0, 17], sizes = [1, 128], strides = [1, 1]} : vector<1x256xf32> to vector<1x128xf32>
    %c17 = arith.constant 17 : index
    %c0_20 = arith.constant 0 : index
    %37 = vector.load %arg4[%c17, %c0_20] : memref<24x128xf32, #tpu.memory_space<vmem>>, vector<1x128xf32>
    tpu.vector_store %arg4[%c17, %c0_20], %36 {strides = array<i32>} : memref<24x128xf32, #tpu.memory_space<vmem>>, vector<1x128xf32>,
    %38 = vector.extract_strided_slice %1 {offsets = [0, 18], sizes = [1, 128], strides = [1, 1]} : vector<1x256xf32> to vector<1x128xf32>
    %c18 = arith.constant 18 : index
    %c0_21 = arith.constant 0 : index
    %39 = vector.load %arg4[%c18, %c0_21] : memref<24x128xf32, #tpu.memory_space<vmem>>, vector<1x128xf32>
    tpu.vector_store %arg4[%c18, %c0_21], %38 {strides = array<i32>} : memref<24x128xf32, #tpu.memory_space<vmem>>, vector<1x128xf32>,
    %40 = vector.extract_strided_slice %1 {offsets = [0, 19], sizes = [1, 128], strides = [1, 1]} : vector<1x256xf32> to vector<1x128xf32>
    %c19 = arith.constant 19 : index
    %c0_22 = arith.constant 0 : index
    %41 = vector.load %arg4[%c19, %c0_22] : memref<24x128xf32, #tpu.memory_space<vmem>>, vector<1x128xf32>
    tpu.vector_store %arg4[%c19, %c0_22], %40 {strides = array<i32>} : memref<24x128xf32, #tpu.memory_space<vmem>>, vector<1x128xf32>,
    %cst = arith.constant 1.000000e+00 : f32
    %42 = vector.broadcast %cst : f32 to vector<4x128xf32>
    %c20 = arith.constant 20 : index
    %c0_23 = arith.constant 0 : index
    %43 = vector.load %arg4[%c20, %c0_23] : memref<24x128xf32, #tpu.memory_space<vmem>>, vector<4x128xf32>
    tpu.vector_store %arg4[%c20, %c0_23], %42 {strides = array<i32>} : memref<24x128xf32, #tpu.memory_space<vmem>>, vector<4x128xf32>,
    %c0_24 = arith.constant 0 : index
    %c0_25 = arith.constant 0 : index
    %44 = vector.load %arg2[%c0_24, %c0_25] : memref<256x24xf32, #tpu.memory_space<vmem>>, vector<256x24xf32>
    %c0_26 = arith.constant 0 : index
    %c0_27 = arith.constant 0 : index
    %45 = vector.load %arg4[%c0_26, %c0_27] : memref<24x128xf32, #tpu.memory_space<vmem>>, vector<24x128xf32>
    %cst_28 = arith.constant dense<0.000000e+00> : vector<256x128xf32>
    %46 = tpu.matmul %44, %45, %cst_28 {dimension_numbers = #tpu.dot_dimension_numbers<[1], [0], [0], [1], [0, 0, 1, 1], [], []>} : vector<256x24xf32>, vector<24x128xf32>, vector<256x128xf32> -> vector<256x128xf32>
    %cst_29 = arith.constant 0.000000e+00 : f32
    %47 = vector.broadcast %cst_29 : f32 to vector<256x128xf32>
    %48 = arith.maximumf %46, %47 : vector<256x128xf32>
    %c0_30 = arith.constant 0 : index
    %c0_31 = arith.constant 0 : index
    %c0_32 = arith.constant 0 : index
    %49 = vector.load %arg3[%c0_30, %c0_31, %c0_32] : memref<1x256x128xf32, #tpu.memory_space<vmem>>, vector<1x256x128xf32>
    %50 = vector.shape_cast %49 : vector<1x256x128xf32> to vector<256x128xf32>
    %51 = vector.shape_cast %48 : vector<256x128xf32> to vector<1x256x128xf32>
    tpu.vector_store %arg3[%c0_30, %c0_31, %c0_32], %51 {strides = array<i32>} : memref<1x256x128xf32, #tpu.memory_space<vmem>>, vector<1x256x128xf32>,
    return
  }
  func.func @transform_0(%arg0: i32) -> (i32, i32, i32) {
    %c0_i32 = arith.constant 0 : i32
    %c0_i32_0 = arith.constant 0 : i32
    %c0_i32_1 = arith.constant 0 : i32
    return %arg0, %c0_i32, %c0_i32_0 : i32, i32, i32
  }
  func.func @transform_1(%arg0: i32) -> (i32, i32) {
    %c0_i32 = arith.constant 0 : i32
    %c0_i32_0 = arith.constant 0 : i32
    %c0_i32_1 = arith.constant 0 : i32
    return %c0_i32, %c0_i32_0 : i32, i32
  }
  func.func @transform_2(%arg0: i32) -> (i32, i32, i32) {
    %c0_i32 = arith.constant 0 : i32
    %c0_i32_0 = arith.constant 0 : i32
    %c0_i32_1 = arith.constant 0 : i32
    return %arg0, %c0_i32, %c0_i32_0 : i32, i32, i32
  }
}

</mosaic_0001>

<bundles_post_ra>
// kernel: tpu_custom_call.1
= control target key start
LH: loop header
LB: loop body
LE: loop exit
PB: predicated region body
PF: predicated region fallthrough
CT: control target
= control target key end

     0   :  { %s990_s9 = smov 0   ;;  %s1194_s0 = inlined_call_operand.vmem [shape: f32[2,1,256], index: 0, kind: input, shape index: {}]   ;;  %s1195_s1 = inlined_call_operand.vmem [shape: f32[256,24], index: 1, kind: input, shape index: {}]   ;;  %s1196_s2 = inlined_call_operand.vmem [shape: f32[2,256,45], index: 2, kind: output, shape index: {}]  }
   0x1 LB: > { %s781_s10 = sadd.s32 4294967295, %s953_s9   ;;  %p785_p0 = scmp.ge.s32.totalorder %s953_s9, 1  ;;  %s953_s9 = sphi %s990_s9, %s12_s9  }
   0x2   : > { %p111_p1 = scmp.lt.s32.totalorder %s953_s9, 3 }
   0x4   : > { %p112_p2 = pnand %p785_p0, %p111_p1 }
   0x5   : > { %p132_p3 = scmp.lt.s32.totalorder (!%p112_p2), %s781_s10, 1  ;;  %s955_s15 = smov (!%p112_p2), 111  }
   0x6   : > { %115 = sbr.rel (%p112_p2) target bundleno = 443 (0x1bb), region = 28  ;;  %s956_s16 = smov (!%p112_p2), 112  }
   0x7   : > { %s958_s17 = smov (!%p112_p2), 110   ;;  %s959_s18 = smov (!%p112_p2), 109  }
   0x8   : > { %s960_s19 = smov (!%p112_p2), 120   ;;  %s961_s20 = smov (!%p112_p2), 119  }
   0x9   : > { %s962_s21 = smov (!%p112_p2), 118   ;;  %s963_s22 = smov (!%p112_p2), 117  }
   0xa   : > { %s964_s23 = smov (!%p112_p2), 116   ;;  %s965_s24 = smov (!%p112_p2), 115  }
   0xb   : > { %v144_v0 = vlaneseq  ;;  %s1198_s10 = smov (!%p132_p3, %s781_s10), 1  ;;  %v957_v7 = vmov 1.0   ;;  %s966_s25 = smov 114   ;;  %v305_v8 = vld [vmem:[%s1195_s1] sm:$0xff]  ;;  %vm340_vm0 = vcmask 195584   ;;  %vm284_vm1 = vcmask 908288  }
   0xc   : > { %s786_s11 = sshll.u32 %s1198_s10, 1  ;;  %304 = vst [vmem:[#allocation2 + $0x14] sm:$0xf] %v957_v7  ;;  %s967_s26 = smov 113   ;;  %v321_v9 = vld [vmem:[%s1195_s1 + $0x80] sm:$0xff]  ;;  %865 = vmatprep.mubr.msk.f32.mxu0 %vm340_vm0, %v305_v8  ;;  %vm276_vm2 = vcmask 916480  }
   0xd   : > { %v145_v1 = vshrl.u32 %v144_v0, 7  ;;  %s135_s14 = scalar_lea.vmem %s1194_s0, %s786_s11  ;;  %s968_s27 = smov 127   ;;  %889 = vmatprep.mubr.msk.f32.mxu1 %vm340_vm0, %v321_v9  ;;  %vm292_vm3 = vcmask 900096   ;;  %vm300_vm4 = vcmask 891904   ;;  %vm212_vm5 = vcmask 982016   ;;  %v322_v7 = vld [vmem:[%s1195_s1 + $0x88] sm:$0xff] }
   0xe   : > { %v141_v4 = vld [vmem:[%s135_s14] sm:$0x3]  ;;  %s969_s28 = smov 126   ;;  %s970_s29 = smov 125   ;;  %vm220_vm6 = vcmask 973824   ;;  %vm228_vm7 = vcmask 965632  }
   0xf   : > { %v146_v2 = vsub.s32 0, %v145_v1  ;;  %v150_v3 = vsub.s32 1, %v145_v1  ;;  %142 = vst [vmem:[#allocation2] sm:$0x1] %v141_v4  ;;  %s971_s30 = smov 124   ;;  %s972_s3 = smov 123  }
  0x10   : > { %s973_s4 = smov 122   ;;  %s974_s11 = smov 121   ;;  %vm236_vm8 = vcmask 957440   ;;  %vm244_vm9 = vcmask 949248   ;;  %vm252_vm10 = vcmask 941056   ;;  %vm260_vm11 = vcmask 932864  }
  0x11   : > { %v1004_v5 = vrot.slane %v141_v4, %v146_v2  ;;  %v151_v6 = vrot.slane %v141_v4, %v150_v3  ;;  %vm268_vm12 = vcmask 924672   ;;  %vm156_vm13 = vcmask 1039360   ;;  %v307_v8 = vld [vmem:[%s1195_s1 + $0x10] sm:$0xff] }
  0x12   : > { %vm164_vm14 = vcmask 1031168   ;;  %vm172_vm15 = vcmask 1022976   ;;  %v323_v9 = vld [vmem:[%s1195_s1 + $0x90] sm:$0xff] }
  0x13   : > { %280 = vrot.lane.b32.xlu1 %v1004_v5, %s955_s15  ;;  %272 = vrot.lane.b32.xlu0 %v1004_v5, %s956_s16 }
  0x17   : > { %282 = vrot.lane.b32.xlu1 %v151_v6, %s955_s15  ;;  %274 = vrot.lane.b32.xlu0 %v151_v6, %s956_s16 }
  0x1b   : > { %290 = vrot.lane.b32.xlu1 %v151_v6, %s958_s17  ;;  %288 = vrot.lane.b32.xlu0 %v1004_v5, %s958_s17 }
  0x1f   : > { %298 = vrot.lane.b32.xlu1 %v151_v6, %s959_s18  ;;  %296 = vrot.lane.b32.xlu0 %v1004_v5, %s959_s18 }
  0x23   : > { %210 = vrot.lane.b32.xlu1 %v151_v6, %s960_s19  ;;  %208 = vrot.lane.b32.xlu0 %v1004_v5, %s960_s19 }
  0x27   : > { %218 = vrot.lane.b32.xlu1 %v151_v6, %s961_s20  ;;  %216 = vrot.lane.b32.xlu0 %v1004_v5, %s961_s20  ;;  %s823_s20 = sshll.u32 %s1198_s10, 8 }
  0x2b   : > { %226 = vrot.lane.b32.xlu1 %v151_v6, %s962_s21  ;;  %224 = vrot.lane.b32.xlu0 %v1004_v5, %s962_s21 }
  0x2f   : > { %234 = vrot.lane.b32.xlu1 %v151_v6, %s963_s22  ;;  %232 = vrot.lane.b32.xlu0 %v1004_v5, %s963_s22 }
  0x33   : > { %242 = vrot.lane.b32.xlu1 %v151_v6, %s964_s23  ;;  %240 = vrot.lane.b32.xlu0 %v1004_v5, %s964_s23  ;;  %s1157_s23 = scalar_lea.vmem %s1196_s2, %s823_s20 }
  0x37   : > { %250 = vrot.lane.b32.xlu1 %v151_v6, %s965_s24  ;;  %248 = vrot.lane.b32.xlu0 %v1004_v5, %s965_s24 }
  0x3b   : > { %258 = vrot.lane.b32.xlu1 %v151_v6, %s966_s25  ;;  %256 = vrot.lane.b32.xlu0 %v1004_v5, %s966_s25 }
  0x3f   : > { %266 = vrot.lane.b32.xlu1 %v151_v6, %s967_s26  ;;  %264 = vrot.lane.b32.xlu0 %v1004_v5, %s967_s26 }
  0x43   : > { %154 = vrot.lane.b32.xlu1 %v151_v6, %s968_s27  ;;  %152 = vrot.lane.b32.xlu0 %v1004_v5, %s968_s27 }
  0x47   : > { %162 = vrot.lane.b32.xlu1 %v151_v6, %s969_s28  ;;  %160 = vrot.lane.b32.xlu0 %v1004_v5, %s969_s28 }
  0x4b   : > { %170 = vrot.lane.b32.xlu1 %v151_v6, %s970_s29  ;;  %168 = vrot.lane.b32.xlu0 %v1004_v5, %s970_s29 }
  0x4f   : > { %178 = vrot.lane.b32.xlu1 %v151_v6, %s971_s30  ;;  %176 = vrot.lane.b32.xlu0 %v1004_v5, %s971_s30 }
  0x53   : > { %186 = vrot.lane.b32.xlu1 %v151_v6, %s972_s3  ;;  %184 = vrot.lane.b32.xlu0 %v1004_v5, %s972_s3 }
  0x57   : > { %194 = vrot.lane.b32.xlu1 %v151_v6, %s973_s4  ;;  %192 = vrot.lane.b32.xlu0 %v1004_v5, %s973_s4 }
  0x5b   : > { %202 = vrot.lane.b32.xlu1 %v151_v6, %s974_s11  ;;  %200 = vrot.lane.b32.xlu0 %v1004_v5, %s974_s11  ;;  %v306_v6 = vld [vmem:[%s1195_s1 + $0x8] sm:$0xff] }
  0x85   : > { %v281_v10 = vpop.permute.xlu1 %280  ;;  %v273_v11 = vpop.permute.xlu0 %272 }
  0x89   : > { %v283_v12 = vpop.permute.xlu1 %282  ;;  %v275_v13 = vpop.permute.xlu0 %274 }
  0x8a   : > { %v285_v14 = vsel %vm284_vm1, %v281_v10, %v283_v12  ;;  %v277_v15 = vsel %vm276_vm2, %v273_v11, %v275_v13  ;;  %vm180_vm1 = vcmask 1014784   ;;  %vm188_vm2 = vcmask 1006592   ;;  %v308_v10 = vld [vmem:[%s1195_s1 + $0x18] sm:$0xff]  ;;  %v309_v12 = vld [vmem:[%s1195_s1 + $0x20] sm:$0xff] }
  0x8b   : > { %287 = vst [vmem:[#allocation2 + $0x11] sm:$0x1] %v285_v14  ;;  %279 = vst [vmem:[#allocation2 + $0x10] sm:$0x1] %v277_v15  ;;  %v324_v11 = vld [vmem:[%s1195_s1 + $0x98] sm:$0xff]  ;;  %v325_v13 = vld [vmem:[%s1195_s1 + $0xa0] sm:$0xff] }
  0x8c   : > { %v310_v14 = vld [vmem:[%s1195_s1 + $0x28] sm:$0xff] }
  0x8d   : > { %v291_v16 = vpop.permute.xlu1 %290  ;;  %v289_v17 = vpop.permute.xlu0 %288  ;;  %v326_v15 = vld [vmem:[%s1195_s1 + $0xa8] sm:$0xff] }
  0x8e   : > { %v293_v18 = vsel %vm292_vm3, %v289_v17, %v291_v16  ;;  %vm196_vm3 = vcmask 998400   ;;  %v311_v16 = vld [vmem:[%s1195_s1 + $0x30] sm:$0xff] }
  0x8f   : > { %295 = vst [vmem:[#allocation2 + $0x12] sm:$0x1] %v293_v18  ;;  %v327_v17 = vld [vmem:[%s1195_s1 + $0xb0] sm:$0xff]  ;;  %v312_v18 = vld [vmem:[%s1195_s1 + $0x38] sm:$0xff] }
  0x91   : > { %v299_v19 = vpop.permute.xlu1 %298  ;;  %v297_v20 = vpop.permute.xlu0 %296 }
  0x92   : > { %v301_v21 = vsel %vm300_vm4, %v297_v20, %v299_v19  ;;  %vm204_vm4 = vcmask 990208   ;;  %v328_v19 = vld [vmem:[%s1195_s1 + $0xb8] sm:$0xff]  ;;  %v313_v20 = vld [vmem:[%s1195_s1 + $0x40] sm:$0xff] }
  0x93   : > { %303 = vst [vmem:[#allocation2 + $0x13] sm:$0x1] %v301_v21  ;;  %v329_v21 = vld [vmem:[%s1195_s1 + $0xc0] sm:$0xff] }
  0x95   : > { %v211_v22 = vpop.permute.xlu1 %210  ;;  %v209_v23 = vpop.permute.xlu0 %208 }
  0x96   : > { %v213_v24 = vsel %vm212_vm5, %v209_v23, %v211_v22  ;;  %v314_v22 = vld [vmem:[%s1195_s1 + $0x48] sm:$0xff] }
  0x97   : > { %215 = vst [vmem:[#allocation2 + $0x8] sm:$0x1] %v213_v24  ;;  %v330_v23 = vld [vmem:[%s1195_s1 + $0xc8] sm:$0xff]  ;;  %v315_v24 = vld [vmem:[%s1195_s1 + $0x50] sm:$0xff] }
  0x99   : > { %v219_v25 = vpop.permute.xlu1 %218  ;;  %v217_v26 = vpop.permute.xlu0 %216 }
  0x9a   : > { %v221_v27 = vsel %vm220_vm6, %v217_v26, %v219_v25  ;;  %v339_v28 = vld [vmem:[#allocation2 + $0x10] sm:$0xff]  ;;  %v316_v26 = vld [vmem:[%s1195_s1 + $0x58] sm:$0xff] }
  0x9b   : > { %223 = vst [vmem:[#allocation2 + $0x9] sm:$0x1] %v221_v27  ;;  %859 = vmatprep.subr.mxu0 %v339_v28  ;;  %913 = vmatprep.subr.mxu1 %v339_v28  ;;  %v331_v25 = vld [vmem:[%s1195_s1 + $0xd0] sm:$0xff]  ;;  %v332_v27 = vld [vmem:[%s1195_s1 + $0xd8] sm:$0xff] }
  0x9c   : > { %860 = vmatpush3.msra.mxu0 %v339_v28  ;;  %916 = vmatpush3.msra.mxu1 %v339_v28  ;;  %v317_v28 = vld [vmem:[%s1195_s1 + $0x60] sm:$0xff] }
  0x9d   : > { %v227_v29 = vpop.permute.xlu1 %226  ;;  %v225_v30 = vpop.permute.xlu0 %224 }
  0x9e   : > { %v229_v31 = vsel %vm228_vm7, %v225_v30, %v227_v29  ;;  %v333_v29 = vld [vmem:[%s1195_s1 + $0xe0] sm:$0xff]  ;;  %v318_v30 = vld [vmem:[%s1195_s1 + $0x68] sm:$0xff] }
  0x9f   : > { %231 = vst [vmem:[#allocation2 + $0xa] sm:$0x1] %v229_v31  ;;  %v334_v31 = vld [vmem:[%s1195_s1 + $0xe8] sm:$0xff] }
  0xa1   : > { %v235_v32 = vpop.permute.xlu1 %234  ;;  %v233_v33 = vpop.permute.xlu0 %232 }
  0xa2   : > { %v237_v34 = vsel %vm236_vm8, %v233_v33, %v235_v32  ;;  %v319_v32 = vld [vmem:[%s1195_s1 + $0x70] sm:$0xff] }
  0xa3   : > { %239 = vst [vmem:[#allocation2 + $0xb] sm:$0x1] %v237_v34  ;;  %v335_v33 = vld [vmem:[%s1195_s1 + $0xf0] sm:$0xff]  ;;  %v320_v34 = vld [vmem:[%s1195_s1 + $0x78] sm:$0xff] }
  0xa5   : > { %v243_v35 = vpop.permute.xlu1 %242  ;;  %v241_v36 = vpop.permute.xlu0 %240 }
  0xa6   : > { %v245_v37 = vsel %vm244_vm9, %v241_v36, %v243_v35  ;;  %v336_v35 = vld [vmem:[%s1195_s1 + $0xf8] sm:$0xff] }
  0xa7   : > { %247 = vst [vmem:[#allocation2 + $0xc] sm:$0x1] %v245_v37 }
  0xa9   : > { %v251_v38 = vpop.permute.xlu1 %250  ;;  %v249_v39 = vpop.permute.xlu0 %248 }
  0xaa   : > { %v253_v40 = vsel %vm252_vm10, %v249_v39, %v251_v38 }
  0xab   : > { %255 = vst [vmem:[#allocation2 + $0xd] sm:$0x1] %v253_v40 }
  0xad   : > { %v259_v41 = vpop.permute.xlu1 %258  ;;  %v257_v42 = vpop.permute.xlu0 %256 }
  0xae   : > { %v261_v43 = vsel %vm260_vm11, %v257_v42, %v259_v41 }
  0xaf   : > { %263 = vst [vmem:[#allocation2 + $0xe] sm:$0x1] %v261_v43 }
  0xb1   : > { %v267_v44 = vpop.permute.xlu1 %266  ;;  %v265_v45 = vpop.permute.xlu0 %264 }
  0xb2   : > { %v269_v46 = vsel %vm268_vm12, %v265_v45, %v267_v44 }
  0xb3   : > { %271 = vst [vmem:[#allocation2 + $0xf] sm:$0x1] %v269_v46 }
  0xb5   : > { %v155_v47 = vpop.permute.xlu1 %154  ;;  %v153_v48 = vpop.permute.xlu0 %152 }
  0xb6   : > { %v157_v49 = vsel %vm156_vm13, %v153_v48, %v155_v47 }
  0xb7   : > { %159 = vst [vmem:[#allocation2 + $0x1] sm:$0x1] %v157_v49 }
  0xb9   : > { %v163_v50 = vpop.permute.xlu1 %162  ;;  %v161_v51 = vpop.permute.xlu0 %160 }
  0xba   : > { %v165_v52 = vsel %vm164_vm14, %v161_v51, %v163_v50  ;;  %v338_v53 = vld [vmem:[#allocation2 + $0x8] sm:$0xff] }
  0xbb   : > { %167 = vst [vmem:[#allocation2 + $0x2] sm:$0x1] %v165_v52  ;;  %861 = vmatprep.subr.mxu0 %v338_v53  ;;  %914 = vmatprep.subr.mxu1 %v338_v53 }
  0xbc   : > { %862 = vmatpush3.msra.mxu0 %v338_v53  ;;  %917 = vmatpush3.msra.mxu1 %v338_v53 }
  0xbd   : > { %v171_v54 = vpop.permute.xlu1 %170  ;;  %v169_v55 = vpop.permute.xlu0 %168 }
  0xbe   : > { %v173_v56 = vsel %vm172_vm15, %v169_v55, %v171_v54 }
  0xbf   : > { %175 = vst [vmem:[#allocation2 + $0x3] sm:$0x1] %v173_v56 }
  0xc1   : > { %v179_v57 = vpop.permute.xlu1 %178  ;;  %v177_v58 = vpop.permute.xlu0 %176 }
  0xc2   : > { %v181_v59 = vsel %vm180_vm1, %v177_v58, %v179_v57 }
  0xc3   : > { %183 = vst [vmem:[#allocation2 + $0x4] sm:$0x1] %v181_v59 }
  0xc5   : > { %v187_v60 = vpop.permute.xlu1 %186  ;;  %v185_v61 = vpop.permute.xlu0 %184 }
  0xc6   : > { %v189_v62 = vsel %vm188_vm2, %v185_v61, %v187_v60 }
  0xc7   : > { %191 = vst [vmem:[#allocation2 + $0x5] sm:$0x1] %v189_v62 }
  0xc9   : > { %v195_v63 = vpop.permute.xlu1 %194  ;;  %v193_v0 = vpop.permute.xlu0 %192 }
  0xca   : > { %v197_v1 = vsel %vm196_vm3, %v193_v0, %v195_v63 }
  0xcb   : > { %199 = vst [vmem:[#allocation2 + $0x6] sm:$0x1] %v197_v1 }
  0xcd   : > { %v203_v2 = vpop.permute.xlu1 %202  ;;  %v201_v3 = vpop.permute.xlu0 %200 }
  0xce   : > { %v205_v4 = vsel %vm204_vm4, %v201_v3, %v203_v2 }
  0xcf   : > { %207 = vst [vmem:[#allocation2 + $0x7] sm:$0x1] %v205_v4 }
  0xd6   : > { %v337_v5 = vld [vmem:[#allocation2] sm:$0xff] }
  0xd7   : > { %863 = vmatprep.subr.mxu0 %v337_v5  ;;  %915 = vmatprep.subr.mxu1 %v337_v5 }
  0xd8   : > { %864 = vmatpush3.msra.mxu0 %v337_v5  ;;  %918 = vmatpush3.msra.mxu1 %v337_v5 }
  0xd9   : > { %866 = vmatmul.mubr.msk.f32.vlgmr.msra.gmra.mxu0 %vm340_vm0, %v306_v6  ;;  %890 = vmatmul.mubr.msk.f32.vlgmr.msra.gmra.mxu1 %vm340_vm0, %v322_v7 }
  0xda   : > { %868 = vmatprep.mubr.msk.f32.mxu0 %vm340_vm0, %v307_v8  ;;  %892 = vmatprep.mubr.msk.f32.mxu1 %vm340_vm0, %v323_v9 }
  0xdd   : > { %869 = vmatmul.mubr.msk.f32.gmra.mxu0 %vm340_vm0, %v308_v10  ;;  %893 = vmatmul.mubr.msk.f32.gmra.mxu1 %vm340_vm0, %v324_v11 }
  0xde   : > { %871 = vmatprep.mubr.msk.f32.mxu0 %vm340_vm0, %v309_v12  ;;  %895 = vmatprep.mubr.msk.f32.mxu1 %vm340_vm0, %v325_v13 }
  0xe1   : > { %872 = vmatmul.mubr.msk.f32.gmra.mxu0 %vm340_vm0, %v310_v14  ;;  %896 = vmatmul.mubr.msk.f32.gmra.mxu1 %vm340_vm0, %v326_v15 }
  0xe2   : > { %874 = vmatprep.mubr.msk.f32.mxu0 %vm340_vm0, %v311_v16  ;;  %898 = vmatprep.mubr.msk.f32.mxu1 %vm340_vm0, %v327_v17 }
  0xe5   : > { %875 = vmatmul.mubr.msk.f32.gmra.mxu0 %vm340_vm0, %v312_v18  ;;  %899 = vmatmul.mubr.msk.f32.gmra.mxu1 %vm340_vm0, %v328_v19 }
  0xe6   : > { %877 = vmatprep.mubr.msk.f32.mxu0 %vm340_vm0, %v313_v20  ;;  %901 = vmatprep.mubr.msk.f32.mxu1 %vm340_vm0, %v329_v21 }
  0xe9   : > { %878 = vmatmul.mubr.msk.f32.gmra.mxu0 %vm340_vm0, %v314_v22  ;;  %902 = vmatmul.mubr.msk.f32.gmra.mxu1 %vm340_vm0, %v330_v23 }
  0xea   : > { %880 = vmatprep.mubr.msk.f32.mxu0 %vm340_vm0, %v315_v24  ;;  %904 = vmatprep.mubr.msk.f32.mxu1 %vm340_vm0, %v331_v25 }
  0xed   : > { %881 = vmatmul.mubr.msk.f32.gmra.mxu0 %vm340_vm0, %v316_v26  ;;  %905 = vmatmul.mubr.msk.f32.gmra.mxu1 %vm340_vm0, %v332_v27 }
  0xee   : > { %883 = vmatprep.mubr.msk.f32.mxu0 %vm340_vm0, %v317_v28  ;;  %907 = vmatprep.mubr.msk.f32.mxu1 %vm340_vm0, %v333_v29 }
  0xf1   : > { %884 = vmatmul.mubr.msk.f32.gmra.mxu0 %vm340_vm0, %v318_v30  ;;  %908 = vmatmul.mubr.msk.f32.gmra.mxu1 %vm340_vm0, %v334_v31 }
  0xf2   : > { %886 = vmatprep.mubr.msk.f32.mxu0 %vm340_vm0, %v319_v32  ;;  %910 = vmatprep.mubr.msk.f32.mxu1 %vm340_vm0, %v335_v33 }
  0xf5   : > { %887 = vmatmul.mubr.msk.f32.gmra.mxu0 %vm340_vm0, %v320_v34  ;;  %911 = vmatmul.mubr.msk.f32.gmra.mxu1 %vm340_vm0, %v336_v35 }
 0x199   : > { %v867_v36 = vpop.f32.mrf.mxu0  ;;  %v891_v37 = vpop.f32.mrf.mxu1 }
 0x19a   : > { %v663_v38 = vmax.f32 %v867_v36, 0.0  ;;  %v679_v39 = vmax.f32 %v891_v37, 0.0 }
 0x19b   : > { %v503_v40 = vpop.f32.mrf.mxu0  ;;  %v583_v41 = vpop.f32.mrf.mxu1 }
 0x19c   : > { %695 = vst [vmem:[%s1157_s23 + $0x8] sm:$0xff] %v663_v38  ;;  %711 = vst [vmem:[%s1157_s23 + $0x88] sm:$0xff] %v679_v39  ;;  %v662_v42 = vmax.f32 %v503_v40, 0.0  ;;  %v678_v43 = vmax.f32 %v583_v41, 0.0 }
 0x19d   : > { %v870_v44 = vpop.f32.mrf.mxu0  ;;  %v894_v45 = vpop.f32.mrf.mxu1 }
 0x19e   : > { %694 = vst [vmem:[%s1157_s23] sm:$0xff] %v662_v42  ;;  %710 = vst [vmem:[%s1157_s23 + $0x80] sm:$0xff] %v678_v43  ;;  %v665_v46 = vmax.f32 %v870_v44, 0.0  ;;  %v681_v47 = vmax.f32 %v894_v45, 0.0 }
 0x19f   : > { %v513_v48 = vpop.f32.mrf.mxu0  ;;  %v593_v49 = vpop.f32.mrf.mxu1 }
 0x1a0   : > { %697 = vst [vmem:[%s1157_s23 + $0x18] sm:$0xff] %v665_v46  ;;  %713 = vst [vmem:[%s1157_s23 + $0x98] sm:$0xff] %v681_v47  ;;  %v664_v50 = vmax.f32 %v513_v48, 0.0  ;;  %v680_v51 = vmax.f32 %v593_v49, 0.0 }
 0x1a1   : > { %v873_v52 = vpop.f32.mrf.mxu0  ;;  %v897_v53 = vpop.f32.mrf.mxu1 }
 0x1a2   : > { %696 = vst [vmem:[%s1157_s23 + $0x10] sm:$0xff] %v664_v50  ;;  %712 = vst [vmem:[%s1157_s23 + $0x90] sm:$0xff] %v680_v51  ;;  %v667_v54 = vmax.f32 %v873_v52, 0.0  ;;  %v683_v55 = vmax.f32 %v897_v53, 0.0 }
 0x1a3   : > { %v523_v56 = vpop.f32.mrf.mxu0  ;;  %v603_v57 = vpop.f32.mrf.mxu1 }
 0x1a4   : > { %699 = vst [vmem:[%s1157_s23 + $0x28] sm:$0xff] %v667_v54  ;;  %715 = vst [vmem:[%s1157_s23 + $0xa8] sm:$0xff] %v683_v55  ;;  %v666_v58 = vmax.f32 %v523_v56, 0.0  ;;  %v682_v59 = vmax.f32 %v603_v57, 0.0 }
 0x1a5   : > { %v876_v60 = vpop.f32.mrf.mxu0  ;;  %v900_v61 = vpop.f32.mrf.mxu1 }
 0x1a6   : > { %698 = vst [vmem:[%s1157_s23 + $0x20] sm:$0xff] %v666_v58  ;;  %714 = vst [vmem:[%s1157_s23 + $0xa0] sm:$0xff] %v682_v59  ;;  %v669_v62 = vmax.f32 %v876_v60, 0.0  ;;  %v685_v63 = vmax.f32 %v900_v61, 0.0 }
 0x1a7   : > { %v533_v0 = vpop.f32.mrf.mxu0  ;;  %v613_v1 = vpop.f32.mrf.mxu1 }
 0x1a8   : > { %701 = vst [vmem:[%s1157_s23 + $0x38] sm:$0xff] %v669_v62  ;;  %717 = vst [vmem:[%s1157_s23 + $0xb8] sm:$0xff] %v685_v63  ;;  %v668_v2 = vmax.f32 %v533_v0, 0.0  ;;  %v684_v3 = vmax.f32 %v613_v1, 0.0 }
 0x1a9   : > { %v879_v4 = vpop.f32.mrf.mxu0  ;;  %v903_v5 = vpop.f32.mrf.mxu1 }
 0x1aa   : > { %700 = vst [vmem:[%s1157_s23 + $0x30] sm:$0xff] %v668_v2  ;;  %716 = vst [vmem:[%s1157_s23 + $0xb0] sm:$0xff] %v684_v3  ;;  %v671_v6 = vmax.f32 %v879_v4, 0.0  ;;  %v687_v7 = vmax.f32 %v903_v5, 0.0 }
 0x1ab   : > { %v543_v8 = vpop.f32.mrf.mxu0  ;;  %v623_v9 = vpop.f32.mrf.mxu1 }
 0x1ac   : > { %703 = vst [vmem:[%s1157_s23 + $0x48] sm:$0xff] %v671_v6  ;;  %719 = vst [vmem:[%s1157_s23 + $0xc8] sm:$0xff] %v687_v7  ;;  %v670_v10 = vmax.f32 %v543_v8, 0.0  ;;  %v686_v11 = vmax.f32 %v623_v9, 0.0 }
 0x1ad   : > { %v882_v12 = vpop.f32.mrf.mxu0  ;;  %v906_v13 = vpop.f32.mrf.mxu1 }
 0x1ae   : > { %702 = vst [vmem:[%s1157_s23 + $0x40] sm:$0xff] %v670_v10  ;;  %718 = vst [vmem:[%s1157_s23 + $0xc0] sm:$0xff] %v686_v11  ;;  %v673_v14 = vmax.f32 %v882_v12, 0.0  ;;  %v689_v15 = vmax.f32 %v906_v13, 0.0 }
 0x1af   : > { %v553_v16 = vpop.f32.mrf.mxu0  ;;  %v633_v17 = vpop.f32.mrf.mxu1 }
 0x1b0   : > { %705 = vst [vmem:[%s1157_s23 + $0x58] sm:$0xff] %v673_v14  ;;  %721 = vst [vmem:[%s1157_s23 + $0xd8] sm:$0xff] %v689_v15  ;;  %v672_v18 = vmax.f32 %v553_v16, 0.0  ;;  %v688_v19 = vmax.f32 %v633_v17, 0.0 }
 0x1b1   : > { %v885_v20 = vpop.f32.mrf.mxu0  ;;  %v909_v21 = vpop.f32.mrf.mxu1 }
 0x1b2   : > { %704 = vst [vmem:[%s1157_s23 + $0x50] sm:$0xff] %v672_v18  ;;  %720 = vst [vmem:[%s1157_s23 + $0xd0] sm:$0xff] %v688_v19  ;;  %v675_v22 = vmax.f32 %v885_v20, 0.0  ;;  %v691_v23 = vmax.f32 %v909_v21, 0.0 }
 0x1b3   : > { %v563_v24 = vpop.f32.mrf.mxu0  ;;  %v643_v25 = vpop.f32.mrf.mxu1 }
 0x1b4   : > { %707 = vst [vmem:[%s1157_s23 + $0x68] sm:$0xff] %v675_v22  ;;  %723 = vst [vmem:[%s1157_s23 + $0xe8] sm:$0xff] %v691_v23  ;;  %v674_v26 = vmax.f32 %v563_v24, 0.0  ;;  %v690_v27 = vmax.f32 %v643_v25, 0.0 }
 0x1b5   : > { %v888_v28 = vpop.f32.mrf.mxu0  ;;  %v912_v29 = vpop.f32.mrf.mxu1 }
 0x1b6   : > { %706 = vst [vmem:[%s1157_s23 + $0x60] sm:$0xff] %v674_v26  ;;  %722 = vst [vmem:[%s1157_s23 + $0xe0] sm:$0xff] %v690_v27  ;;  %v677_v30 = vmax.f32 %v888_v28, 0.0  ;;  %v693_v31 = vmax.f32 %v912_v29, 0.0 }
 0x1b7   : > { %v573_v32 = vpop.f32.mrf.mxu0  ;;  %v653_v33 = vpop.f32.mrf.mxu1 }
 0x1b8   : > { %709 = vst [vmem:[%s1157_s23 + $0x78] sm:$0xff] %v677_v30  ;;  %725 = vst [vmem:[%s1157_s23 + $0xf8] sm:$0xff] %v693_v31  ;;  %v676_v34 = vmax.f32 %v573_v32, 0.0  ;;  %v692_v35 = vmax.f32 %v653_v33, 0.0 }
 0x1ba   : > { %708 = vst [vmem:[%s1157_s23 + $0x70] sm:$0xff] %v676_v34  ;;  %724 = vst [vmem:[%s1157_s23 + $0xf0] sm:$0xff] %v692_v35 }
 0x1bb PF: > { %s12_s9 = sadd.s32 1, %s953_s9  }
 0x1bc   : > { %p9_p4 = scmp.ge.s32.totalorder %s12_s9, 4  }
 0x1be   :  { %11 = sbr.rel (!%p9_p4) target bundleno = 1 (0x1), region = 58 }

</bundles_post_ra>
